<compile_context>
chip_gen: v5e
topology: v5e:2x2
jax: 0.10.0
libtpu: 0.0.40
codegen_flags: <defaults>
</compile_context>

<pallas_src>
import functools

import jax
import jax.numpy as jnp
import numpy as np
from jax.experimental import pallas as pl
from jax.experimental.pallas import tpu as pltpu


def _dsconv3x3_kernel(x_ref, dw_ref, b1_ref, pw_ref, b2_ref, o_ref, pad_ref,
                      *, H, W, OFF):
    # x_ref:   (1, Cin, H*W)        input, spatially flattened (lane-dense)
    # dw_ref:  (9, Cin, 1)          depthwise 3x3 weights, BN1 scale folded in
    # b1_ref:  (Cin, 1)             BN1 folded bias
    # pw_ref:  (Cout, Cin) bf16     pointwise weights, BN2 scale folded in
    # b2_ref:  (Cout, 1)            BN2 folded bias
    # o_ref:   (1, Cout, H*W)
    # pad_ref: (Cin, OFF + H*W + OFF) VMEM scratch: flat zero-padded image,
    #          interior starts at lane OFF (multiple of 128, OFF >= W+1).
    Cin = x_ref.shape[1]
    HW = x_ref.shape[2]
    padw = pad_ref.shape[1]

    # Zero only the two halo strips (aligned stores), then the interior
    # (aligned store).  Every 3x3 tap then becomes a static in-bounds lane
    # slice; taps that fall above/below the image read zeros from the halos.
    pad_ref[:, :OFF] = jnp.zeros((Cin, OFF), jnp.float32)
    pad_ref[:, OFF + HW:padw] = jnp.zeros((Cin, padw - OFF - HW), jnp.float32)
    pad_ref[:, OFF:OFF + HW] = x_ref[0]

    # Column-validity masks: left/right image borders wrap to the previous /
    # next row in the flattened buffer, so those taps must be masked to zero.
    # The mask only depends on kw, so it is applied once per column group.
    col = jax.lax.broadcasted_iota(jnp.int32, (1, HW), 1) % W
    left_ok = col >= 1          # tap reads (h, w-1)
    right_ok = col <= W - 2     # tap reads (h, w+1)

    def tap(kh, kw):
        d = (kh - 1) * W + (kw - 1)
        # (Cin, HW) shifted read * per-channel scalar weight (Cin, 1) bcast.
        return pad_ref[:, OFF + d:OFF + d + HW] * dw_ref[kh * 3 + kw]

    acc_l = tap(0, 0) + tap(1, 0) + tap(2, 0)
    acc_c = tap(0, 1) + tap(1, 1) + tap(2, 1)
    acc_r = tap(0, 2) + tap(1, 2) + tap(2, 2)
    acc = acc_c + jnp.where(left_ok, acc_l, 0.0) + jnp.where(right_ok, acc_r, 0.0)

    # BN1 (scale already folded into weights) + ReLU, f32 epilogue.
    s = jnp.maximum(acc + b1_ref[...], 0.0)

    # Pointwise 1x1 conv as one MXU matmul: bf16 operands, f32 accumulation.
    y = jnp.dot(pw_ref[...], s.astype(jnp.bfloat16),
                preferred_element_type=jnp.float32)           # (Cout, HW)
    y = jnp.maximum(y + b2_ref[...], 0.0)                     # BN2 bias + ReLU
    o_ref[0] = y.astype(o_ref.dtype)


def dsconv3x3_pallas(x, dw_weight, bn1_gamma, bn1_beta, bn1_mean, bn1_var,
                     pw_weight, bn2_gamma, bn2_beta, bn2_mean, bn2_var,
                     eps=1e-5):
    """DSConv3x3 forward (stride=1, dilation=1, relu=True), inference BN.

    x: (N, Cin, H, W) NCHW.  dw_weight: (Cin, 1, 3, 3).  pw_weight:
    (Cout, Cin, 1, 1).  Returns (N, Cout, H, W) float32.
    """
    N, Cin, H, W = x.shape
    Cout = pw_weight.shape[0]
    HW = H * W

    # Metadata-only reshape (contiguous trailing dims) -> no HBM traffic.
    x_flat = x.reshape(N, Cin, HW).astype(jnp.float32)

    # Fold inference BatchNorm into per-channel scale/bias; fold the scales
    # into the conv weights so the kernel only has to add a bias.
    s1 = bn1_gamma / jnp.sqrt(bn1_var + eps)
    b1 = (bn1_beta - bn1_mean * s1).reshape(Cin, 1).astype(jnp.float32)
    dw_folded = (dw_weight.reshape(Cin, 9) * s1[:, None]).astype(jnp.float32)
    dw_folded = dw_folded.T.reshape(9, Cin, 1)      # tap-major: [kh*3+kw, c, 1]

    s2 = bn2_gamma / jnp.sqrt(bn2_var + eps)
    b2 = (bn2_beta - bn2_mean * s2).reshape(Cout, 1).astype(jnp.float32)
    pw_folded = (pw_weight.reshape(Cout, Cin) * s2[:, None]).astype(jnp.bfloat16)

    # Lane-aligned interior offset (multiple of 128, >= W+1) so the interior
    # store / center-tap read are unmasked; halos hold the top/bottom zeros.
    off = ((W + 1 + 127) // 128) * 128
    padw = off + HW + off

    kernel = functools.partial(_dsconv3x3_kernel, H=H, W=W, OFF=off)

    out_flat = pl.pallas_call(
        kernel,
        out_shape=jax.ShapeDtypeStruct((N, Cout, HW), jnp.float32),
        grid_spec=pltpu.PrefetchScalarGridSpec(
            num_scalar_prefetch=0,
            grid=(N,),
            in_specs=[
                pl.BlockSpec((1, Cin, HW), lambda n: (n, 0, 0)),
                pl.BlockSpec((9, Cin, 1), lambda n: (0, 0, 0)),
                pl.BlockSpec((Cin, 1), lambda n: (0, 0)),
                pl.BlockSpec((Cout, Cin), lambda n: (0, 0)),
                pl.BlockSpec((Cout, 1), lambda n: (0, 0)),
            ],
            out_specs=pl.BlockSpec((1, Cout, HW), lambda n: (n, 0, 0)),
            scratch_shapes=[pltpu.VMEM((Cin, padw), jnp.float32)],
        ),
        compiler_params=pltpu.CompilerParams(
            dimension_semantics=("parallel",)),
    )(x_flat, dw_folded, b1, pw_folded, b2)

    return out_flat.reshape(N, Cout, H, W)


def _reference(x, dw_weight, g1, be1, m1, v1, pw_weight, g2, be2, m2, v2,
               eps=1e-5):
    """Pure-JAX (f32) reference: depthwise conv+BN+ReLU, 1x1 conv+BN+ReLU."""
    y = jax.lax.conv_general_dilated(
        x.astype(jnp.float32), dw_weight.astype(jnp.float32),
        window_strides=(1, 1), padding=((1, 1), (1, 1)),
        dimension_numbers=("NCHW", "OIHW", "NCHW"),
        feature_group_count=x.shape[1])
    s1 = g1 / jnp.sqrt(v1 + eps)
    b1 = be1 - m1 * s1
    y = jnp.maximum(y * s1[None, :, None, None] + b1[None, :, None, None], 0.0)
    y = jax.lax.conv_general_dilated(
        y, pw_weight.astype(jnp.float32), window_strides=(1, 1),
        padding=((0, 0), (0, 0)), dimension_numbers=("NCHW", "OIHW", "NCHW"))
    s2 = g2 / jnp.sqrt(v2 + eps)
    b2 = be2 - m2 * s2
    return jnp.maximum(y * s2[None, :, None, None] + b2[None, :, None, None], 0.0)


if __name__ == "__main__":
    keys = jax.random.split(jax.random.PRNGKey(0), 11)

    N, Cin, H, W = 2, 4, 16, 16
    Cout = 8  # DSConv3x3(in_channel=4, out_channel=8)

    x = jax.random.normal(keys[0], (N, Cin, H, W), dtype=jnp.float32)
    dw_w = 0.2 * jax.random.normal(keys[1], (Cin, 1, 3, 3), dtype=jnp.float32)
    pw_w = 0.2 * jax.random.normal(keys[2], (Cout, Cin, 1, 1), dtype=jnp.float32)
    g1 = 1.0 + 0.1 * jax.random.normal(keys[3], (Cin,), dtype=jnp.float32)
    be1 = 0.1 * jax.random.normal(keys[4], (Cin,), dtype=jnp.float32)
    m1 = 0.1 * jax.random.normal(keys[5], (Cin,), dtype=jnp.float32)
    v1 = jnp.abs(jax.random.normal(keys[6], (Cin,), dtype=jnp.float32)) + 0.5
    g2 = 1.0 + 0.1 * jax.random.normal(keys[7], (Cout,), dtype=jnp.float32)
    be2 = 0.1 * jax.random.normal(keys[8], (Cout,), dtype=jnp.float32)
    m2 = 0.1 * jax.random.normal(keys[9], (Cout,), dtype=jnp.float32)
    v2 = jnp.abs(jax.random.normal(keys[10], (Cout,), dtype=jnp.float32)) + 0.5

    out = dsconv3x3_pallas(x, dw_w, g1, be1, m1, v1, pw_w, g2, be2, m2, v2)
    out = jax.block_until_ready(out)

    ref = jax.block_until_ready(
        _reference(x, dw_w, g1, be1, m1, v1, pw_w, g2, be2, m2, v2))
    assert out.shape == (N, Cout, H, W)
    # bf16 operands on the pointwise matmul -> slightly relaxed tolerance.
    assert np.allclose(np.asarray(out), np.asarray(ref), atol=3e-2, rtol=3e-2)

    print("KERNEL_OK")
</pallas_src>

<mosaic_0001>
module attributes {stable_mosaic.version = 11 : i64} {
  func.func @_dsconv3x3_kernel(%arg0: i32, %arg1: memref<1x4x256xf32, #tpu.memory_space<vmem>>, %arg2: memref<9x4x1xf32, #tpu.memory_space<vmem>>, %arg3: memref<4x1xf32, #tpu.memory_space<vmem>>, %arg4: memref<8x4xbf16, #tpu.memory_space<vmem>>, %arg5: memref<8x1xf32, #tpu.memory_space<vmem>>, %arg6: memref<1x8x256xf32, #tpu.memory_space<vmem>>, %arg7: memref<4x512xf32, #tpu.memory_space<vmem>>) attributes {dimension_semantics = [#tpu.dimension_semantics<parallel>], iteration_bounds = array<i64: 2>, scalar_prefetch = 0 : i64, scratch_operands = 1 : i64, tpu.core_type = #tpu.core_type<tc>, window_params = [{transform_indices = @transform_0, window_bounds = array<i64: 1, 4, 256>}, {pipeline_mode = #tpu.pipeline_mode<synchronous>, transform_indices = @transform_1, window_bounds = array<i64: 9, 4, 1>}, {pipeline_mode = #tpu.pipeline_mode<synchronous>, transform_indices = @transform_2, window_bounds = array<i64: 4, 1>}, {pipeline_mode = #tpu.pipeline_mode<synchronous>, transform_indices = @transform_3, window_bounds = array<i64: 8, 4>}, {pipeline_mode = #tpu.pipeline_mode<synchronous>, transform_indices = @transform_4, window_bounds = array<i64: 8, 1>}, {transform_indices = @transform_5, window_bounds = array<i64: 1, 8, 256>}]} {
    %cst = arith.constant 0.000000e+00 : f32
    %0 = vector.broadcast %cst : f32 to vector<4x128xf32>
    %c0 = arith.constant 0 : index
    %c0_0 = arith.constant 0 : index
    %1 = vector.load %arg7[%c0, %c0_0] : memref<4x512xf32, #tpu.memory_space<vmem>>, vector<4x128xf32>
    tpu.vector_store %arg7[%c0, %c0_0], %0 {strides = array<i32>} : memref<4x512xf32, #tpu.memory_space<vmem>>, vector<4x128xf32>,
    %cst_1 = arith.constant 0.000000e+00 : f32
    %2 = vector.broadcast %cst_1 : f32 to vector<4x128xf32>
    %c0_2 = arith.constant 0 : index
    %c384 = arith.constant 384 : index
    %3 = vector.load %arg7[%c0_2, %c384] : memref<4x512xf32, #tpu.memory_space<vmem>>, vector<4x128xf32>
    tpu.vector_store %arg7[%c0_2, %c384], %2 {strides = array<i32>} : memref<4x512xf32, #tpu.memory_space<vmem>>, vector<4x128xf32>,
    %c0_3 = arith.constant 0 : index
    %c0_4 = arith.constant 0 : index
    %c0_5 = arith.constant 0 : index
    %4 = vector.load %arg1[%c0_3, %c0_4, %c0_5] : memref<1x4x256xf32, #tpu.memory_space<vmem>>, vector<1x4x256xf32>
    %5 = vector.shape_cast %4 : vector<1x4x256xf32> to vector<4x256xf32>
    %c0_6 = arith.constant 0 : index
    %c128 = arith.constant 128 : index
    %6 = vector.load %arg7[%c0_6, %c128] : memref<4x512xf32, #tpu.memory_space<vmem>>, vector<4x256xf32>
    tpu.vector_store %arg7[%c0_6, %c128], %5 {strides = array<i32>} : memref<4x512xf32, #tpu.memory_space<vmem>>, vector<4x256xf32>,
    %7 = tpu.iota {dimensions = array<i32: 1>} : vector<1x256xi32>
    %c16_i32 = arith.constant 16 : i32
    %c0_i32 = arith.constant 0 : i32
    %8 = arith.cmpi eq, %c16_i32, %c0_i32 : i32
    %c1_i32 = arith.constant 1 : i32
    %9 = arith.select %8, %c1_i32, %c16_i32 : i32
    %10 = vector.broadcast %9 : i32 to vector<1x256xi32>
    %11 = arith.remsi %7, %10 : vector<1x256xi32>
    %c0_i32_7 = arith.constant 0 : i32
    %12 = vector.broadcast %c0_i32_7 : i32 to vector<1x256xi32>
    %13 = arith.cmpi ne, %11, %12 : vector<1x256xi32>
    %c0_i32_8 = arith.constant 0 : i32
    %14 = vector.broadcast %c0_i32_8 : i32 to vector<1x256xi32>
    %15 = arith.cmpi slt, %11, %14 : vector<1x256xi32>
    %c0_i32_9 = arith.constant 0 : i32
    %16 = arith.cmpi slt, %9, %c0_i32_9 : i32
    %17 = vector.broadcast %16 : i1 to vector<1x256xi1>
    %18 = vector.broadcast %17 : vector<1x256xi1> to vector<1x256xi1>
    %19 = arith.xori %15, %18 : vector<1x256xi1>
    %20 = arith.andi %19, %13 : vector<1x256xi1>
    %21 = vector.broadcast %9 : i32 to vector<1x256xi32>
    %22 = arith.addi %11, %21 : vector<1x256xi32>
    %23 = arith.select %20, %22, %11 : vector<1x256xi1>, vector<1x256xi32>
    %c1_i32_10 = arith.constant 1 : i32
    %24 = vector.broadcast %c1_i32_10 : i32 to vector<1x256xi32>
    %25 = arith.cmpi sge, %23, %24 : vector<1x256xi32>
    %c14_i32 = arith.constant 14 : i32
    %26 = vector.broadcast %c14_i32 : i32 to vector<1x256xi32>
    %27 = arith.cmpi sle, %23, %26 : vector<1x256xi32>
    %c0_11 = arith.constant 0 : index
    %c111 = arith.constant 111 : index
    %28 = vector.load %arg7[%c0_11, %c111] : memref<4x512xf32, #tpu.memory_space<vmem>>, vector<4x256xf32>
    %c0_12 = arith.constant 0 : index
    %c0_13 = arith.constant 0 : index
    %c0_14 = arith.constant 0 : index
    %29 = vector.load %arg2[%c0_12, %c0_13, %c0_14] : memref<9x4x1xf32, #tpu.memory_space<vmem>>, vector<1x4x1xf32>
    %30 = vector.shape_cast %29 : vector<1x4x1xf32> to vector<4x1xf32>
    %31 = vector.broadcast %30 : vector<4x1xf32> to vector<4x256xf32>
    %32 = arith.mulf %28, %31 : vector<4x256xf32>
    %c0_15 = arith.constant 0 : index
    %c127 = arith.constant 127 : index
    %33 = vector.load %arg7[%c0_15, %c127] : memref<4x512xf32, #tpu.memory_space<vmem>>, vector<4x256xf32>
    %c3 = arith.constant 3 : index
    %c0_16 = arith.constant 0 : index
    %c0_17 = arith.constant 0 : index
    %34 = vector.load %arg2[%c3, %c0_16, %c0_17] : memref<9x4x1xf32, #tpu.memory_space<vmem>>, vector<1x4x1xf32>
    %35 = vector.shape_cast %34 : vector<1x4x1xf32> to vector<4x1xf32>
    %36 = vector.broadcast %35 : vector<4x1xf32> to vector<4x256xf32>
    %37 = arith.mulf %33, %36 : vector<4x256xf32>
    %38 = arith.addf %32, %37 : vector<4x256xf32>
    %c0_18 = arith.constant 0 : index
    %c143 = arith.constant 143 : index
    %39 = vector.load %arg7[%c0_18, %c143] : memref<4x512xf32, #tpu.memory_space<vmem>>, vector<4x256xf32>
    %c6 = arith.constant 6 : index
    %c0_19 = arith.constant 0 : index
    %c0_20 = arith.constant 0 : index
    %40 = vector.load %arg2[%c6, %c0_19, %c0_20] : memref<9x4x1xf32, #tpu.memory_space<vmem>>, vector<1x4x1xf32>
    %41 = vector.shape_cast %40 : vector<1x4x1xf32> to vector<4x1xf32>
    %42 = vector.broadcast %41 : vector<4x1xf32> to vector<4x256xf32>
    %43 = arith.mulf %39, %42 : vector<4x256xf32>
    %44 = arith.addf %38, %43 : vector<4x256xf32>
    %c0_21 = arith.constant 0 : index
    %c112 = arith.constant 112 : index
    %45 = vector.load %arg7[%c0_21, %c112] : memref<4x512xf32, #tpu.memory_space<vmem>>, vector<4x256xf32>
    %c1 = arith.constant 1 : index
    %c0_22 = arith.constant 0 : index
    %c0_23 = arith.constant 0 : index
    %46 = vector.load %arg2[%c1, %c0_22, %c0_23] : memref<9x4x1xf32, #tpu.memory_space<vmem>>, vector<1x4x1xf32>
    %47 = vector.shape_cast %46 : vector<1x4x1xf32> to vector<4x1xf32>
    %48 = vector.broadcast %47 : vector<4x1xf32> to vector<4x256xf32>
    %49 = arith.mulf %45, %48 : vector<4x256xf32>
    %c0_24 = arith.constant 0 : index
    %c128_25 = arith.constant 128 : index
    %50 = vector.load %arg7[%c0_24, %c128_25] : memref<4x512xf32, #tpu.memory_space<vmem>>, vector<4x256xf32>
    %c4 = arith.constant 4 : index
    %c0_26 = arith.constant 0 : index
    %c0_27 = arith.constant 0 : index
    %51 = vector.load %arg2[%c4, %c0_26, %c0_27] : memref<9x4x1xf32, #tpu.memory_space<vmem>>, vector<1x4x1xf32>
    %52 = vector.shape_cast %51 : vector<1x4x1xf32> to vector<4x1xf32>
    %53 = vector.broadcast %52 : vector<4x1xf32> to vector<4x256xf32>
    %54 = arith.mulf %50, %53 : vector<4x256xf32>
    %55 = arith.addf %49, %54 : vector<4x256xf32>
    %c0_28 = arith.constant 0 : index
    %c144 = arith.constant 144 : index
    %56 = vector.load %arg7[%c0_28, %c144] : memref<4x512xf32, #tpu.memory_space<vmem>>, vector<4x256xf32>
    %c7 = arith.constant 7 : index
    %c0_29 = arith.constant 0 : index
    %c0_30 = arith.constant 0 : index
    %57 = vector.load %arg2[%c7, %c0_29, %c0_30] : memref<9x4x1xf32, #tpu.memory_space<vmem>>, vector<1x4x1xf32>
    %58 = vector.shape_cast %57 : vector<1x4x1xf32> to vector<4x1xf32>
    %59 = vector.broadcast %58 : vector<4x1xf32> to vector<4x256xf32>
    %60 = arith.mulf %56, %59 : vector<4x256xf32>
    %61 = arith.addf %55, %60 : vector<4x256xf32>
    %c0_31 = arith.constant 0 : index
    %c113 = arith.constant 113 : index
    %62 = vector.load %arg7[%c0_31, %c113] : memref<4x512xf32, #tpu.memory_space<vmem>>, vector<4x256xf32>
    %c2 = arith.constant 2 : index
    %c0_32 = arith.constant 0 : index
    %c0_33 = arith.constant 0 : index
    %63 = vector.load %arg2[%c2, %c0_32, %c0_33] : memref<9x4x1xf32, #tpu.memory_space<vmem>>, vector<1x4x1xf32>
    %64 = vector.shape_cast %63 : vector<1x4x1xf32> to vector<4x1xf32>
    %65 = vector.broadcast %64 : vector<4x1xf32> to vector<4x256xf32>
    %66 = arith.mulf %62, %65 : vector<4x256xf32>
    %c0_34 = arith.constant 0 : index
    %c129 = arith.constant 129 : index
    %67 = vector.load %arg7[%c0_34, %c129] : memref<4x512xf32, #tpu.memory_space<vmem>>, vector<4x256xf32>
    %c5 = arith.constant 5 : index
    %c0_35 = arith.constant 0 : index
    %c0_36 = arith.constant 0 : index
    %68 = vector.load %arg2[%c5, %c0_35, %c0_36] : memref<9x4x1xf32, #tpu.memory_space<vmem>>, vector<1x4x1xf32>
    %69 = vector.shape_cast %68 : vector<1x4x1xf32> to vector<4x1xf32>
    %70 = vector.broadcast %69 : vector<4x1xf32> to vector<4x256xf32>
    %71 = arith.mulf %67, %70 : vector<4x256xf32>
    %72 = arith.addf %66, %71 : vector<4x256xf32>
    %c0_37 = arith.constant 0 : index
    %c145 = arith.constant 145 : index
    %73 = vector.load %arg7[%c0_37, %c145] : memref<4x512xf32, #tpu.memory_space<vmem>>, vector<4x256xf32>
    %c8 = arith.constant 8 : index
    %c0_38 = arith.constant 0 : index
    %c0_39 = arith.constant 0 : index
    %74 = vector.load %arg2[%c8, %c0_38, %c0_39] : memref<9x4x1xf32, #tpu.memory_space<vmem>>, vector<1x4x1xf32>
    %75 = vector.shape_cast %74 : vector<1x4x1xf32> to vector<4x1xf32>
    %76 = vector.broadcast %75 : vector<4x1xf32> to vector<4x256xf32>
    %77 = arith.mulf %73, %76 : vector<4x256xf32>
    %78 = arith.addf %72, %77 : vector<4x256xf32>
    %cst_40 = arith.constant 0.000000e+00 : f32
    %79 = vector.shape_cast %25 : vector<1x256xi1> to vector<1x256xi1>
    %80 = vector.broadcast %79 : vector<1x256xi1> to vector<4x256xi1>
    %81 = vector.broadcast %cst_40 : f32 to vector<4x256xf32>
    %82 = arith.select %80, %44, %81 : vector<4x256xi1>, vector<4x256xf32>
    %83 = arith.addf %61, %82 : vector<4x256xf32>
    %cst_41 = arith.constant 0.000000e+00 : f32
    %84 = vector.shape_cast %27 : vector<1x256xi1> to vector<1x256xi1>
    %85 = vector.broadcast %84 : vector<1x256xi1> to vector<4x256xi1>
    %86 = vector.broadcast %cst_41 : f32 to vector<4x256xf32>
    %87 = arith.select %85, %78, %86 : vector<4x256xi1>, vector<4x256xf32>
    %88 = arith.addf %83, %87 : vector<4x256xf32>
    %c0_42 = arith.constant 0 : index
    %c0_43 = arith.constant 0 : index
    %89 = vector.load %arg3[%c0_42, %c0_43] : memref<4x1xf32, #tpu.memory_space<vmem>>, vector<4x1xf32>
    %90 = vector.broadcast %89 : vector<4x1xf32> to vector<4x256xf32>
    %91 = arith.addf %88, %90 : vector<4x256xf32>
    %cst_44 = arith.constant 0.000000e+00 : f32
    %92 = vector.broadcast %cst_44 : f32 to vector<4x256xf32>
    %93 = arith.maximumf %91, %92 : vector<4x256xf32>
    %c0_45 = arith.constant 0 : index
    %c0_46 = arith.constant 0 : index
    %94 = vector.load %arg4[%c0_45, %c0_46] : memref<8x4xbf16, #tpu.memory_space<vmem>>, vector<8x4xbf16>
    %95 = arith.truncf %93 : vector<4x256xf32> to vector<4x256xbf16>
    %cst_47 = arith.constant dense<0.000000e+00> : vector<8x256xf32>
    %96 = tpu.matmul %94, %95, %cst_47 {dimension_numbers = #tpu.dot_dimension_numbers<[1], [0], [0], [1], [0, 0, 1, 1], [], []>} : vector<8x4xbf16>, vector<4x256xbf16>, vector<8x256xf32> -> vector<8x256xf32>
    %c0_48 = arith.constant 0 : index
    %c0_49 = arith.constant 0 : index
    %97 = vector.load %arg5[%c0_48, %c0_49] : memref<8x1xf32, #tpu.memory_space<vmem>>, vector<8x1xf32>
    %98 = vector.broadcast %97 : vector<8x1xf32> to vector<8x256xf32>
    %99 = arith.addf %96, %98 : vector<8x256xf32>
    %cst_50 = arith.constant 0.000000e+00 : f32
    %100 = vector.broadcast %cst_50 : f32 to vector<8x256xf32>
    %101 = arith.maximumf %99, %100 : vector<8x256xf32>
    %c0_51 = arith.constant 0 : index
    %c0_52 = arith.constant 0 : index
    %c0_53 = arith.constant 0 : index
    %102 = vector.load %arg6[%c0_51, %c0_52, %c0_53] : memref<1x8x256xf32, #tpu.memory_space<vmem>>, vector<1x8x256xf32>
    %103 = vector.shape_cast %102 : vector<1x8x256xf32> to vector<8x256xf32>
    %104 = vector.shape_cast %101 : vector<8x256xf32> to vector<1x8x256xf32>
    tpu.vector_store %arg6[%c0_51, %c0_52, %c0_53], %104 {strides = array<i32>} : memref<1x8x256xf32, #tpu.memory_space<vmem>>, vector<1x8x256xf32>,
    return
  }
  func.func @transform_0(%arg0: i32) -> (i32, i32, i32) {
    %c0_i32 = arith.constant 0 : i32
    %c0_i32_0 = arith.constant 0 : i32
    %c0_i32_1 = arith.constant 0 : i32
    return %arg0, %c0_i32, %c0_i32_0 : i32, i32, i32
  }
  func.func @transform_1(%arg0: i32) -> (i32, i32, i32) {
    %c0_i32 = arith.constant 0 : i32
    %c0_i32_0 = arith.constant 0 : i32
    %c0_i32_1 = arith.constant 0 : i32
    %c0_i32_2 = arith.constant 0 : i32
    return %c0_i32, %c0_i32_0, %c0_i32_1 : i32, i32, i32
  }
  func.func @transform_2(%arg0: i32) -> (i32, i32) {
    %c0_i32 = arith.constant 0 : i32
    %c0_i32_0 = arith.constant 0 : i32
    %c0_i32_1 = arith.constant 0 : i32
    return %c0_i32, %c0_i32_0 : i32, i32
  }
  func.func @transform_3(%arg0: i32) -> (i32, i32) {
    %c0_i32 = arith.constant 0 : i32
    %c0_i32_0 = arith.constant 0 : i32
    %c0_i32_1 = arith.constant 0 : i32
    return %c0_i32, %c0_i32_0 : i32, i32
  }
  func.func @transform_4(%arg0: i32) -> (i32, i32) {
    %c0_i32 = arith.constant 0 : i32
    %c0_i32_0 = arith.constant 0 : i32
    %c0_i32_1 = arith.constant 0 : i32
    return %c0_i32, %c0_i32_0 : i32, i32
  }
  func.func @transform_5(%arg0: i32) -> (i32, i32, i32) {
    %c0_i32 = arith.constant 0 : i32
    %c0_i32_0 = arith.constant 0 : i32
    %c0_i32_1 = arith.constant 0 : i32
    return %arg0, %c0_i32, %c0_i32_0 : i32, i32, i32
  }
}

</mosaic_0001>

<bundles_post_ra>
// kernel: tpu_custom_call.1
= control target key start
LH: loop header
LB: loop body
LE: loop exit
PB: predicated region body
PF: predicated region fallthrough
CT: control target
= control target key end

     0   :  { %10 = vsyncpa [#allocation4], 0  ;;  %s1058_s0 = inlined_call_operand.vmem [shape: f32[2,4,256], index: 0, kind: input, shape index: {}]   ;;  %s1059_s1 = inlined_call_operand.vmem [shape: f32[9,4,1], index: 1, kind: input, shape index: {}]   ;;  %s1060_s2 = inlined_call_operand.vmem [shape: f32[4,1], index: 2, kind: input, shape index: {}]   ;;  %s1061_s3 = inlined_call_operand.vmem [shape: bf16[8,4], index: 3, kind: input, shape index: {}]   ;;  %s1062_s4 = inlined_call_operand.vmem [shape: f32[8,1], index: 4, kind: input, shape index: {}]   ;;  %s1063_s5 = inlined_call_operand.hbm [shape: f32[2,8,256], index: 5, kind: output, shape index: {}]  }
   0x1   :  { %12 = vsyncpa [#allocation4 + $0x1], 0  ;;  %s871_s18 = smov 0   ;;  %s873_s19 = smov 0  }
   0x2   :  { %s875_s20 = smov 0   ;;  %s877_s21 = smov 0  }
   0x3 LB: > { %s892_s22 = sadd.s32 4294967295, %s831_s21   ;;  %s695_s23 = sadd.s32 4294967294, %s831_s21   ;;  %s831_s21 = sphi %s877_s21, %s1069_s21   ;;  %s827_s20 = sphi %s875_s20, %s1068_s20   ;;  %s823_s19 = sphi %s873_s19, %s1067_s19   ;;  %s819_s18 = sphi %s871_s18, %s1066_s18  }
   0x4   : > { %s896_s24 = sadd.s32 1, %s831_s21   ;;  %s135_s25 = sadd.s32 1, %s827_s20 }
   0x5   : > { %s132_s26 = ssub.s32 %s831_s21, %s896_s24  ;;  %p145_p0 = scmp.ne.s32.totalorder %s827_s20, %s823_s19 }
   0x6   : > { %p133_p1 = scmp.eq.s32.totalorder %s132_s26, 0  ;;  %p146_p2 = scmp.eq.s32.totalorder %s892_s22, 1 }
   0x7   : > { %p151_p3 = scmp.ne.s32.totalorder %s823_s19, %s819_s18  ;;  %p152_p4 = scmp.eq.s32.totalorder %s695_s23, 1 }
   0x8   : > { %s907_s27 = scalar_select %p133_p1, %s827_s20, %s135_s25  }
   0x9   : > { %p909_p5 = por %p146_p2, %p145_p0  ;;  %p913_p6 = por %p152_p4, %p151_p3 }
   0xa   : > { %p698_p7 = scmp.ge.s32.totalorder %s831_s21, 1  ;;  %p190_p8 = scmp.lt.s32.totalorder %s831_s21, 3 }
   0xc   : > { %p191_p9 = pnand %p698_p7, %p190_p8 }
   0xd   : > { %p218_p10 = scmp.lt.s32.totalorder (!%p191_p9), %s892_s22, 1  ;;  %s836_s26 = smov (!%p191_p9), 112  }
   0xe   : > { %194 = sbr.rel (%p191_p9) target bundleno = 794 (0x31a), region = 40  ;;  %s837_s7 = smov (!%p191_p9), 96  }
   0xf   : > { %s838_s12 = smov (!%p191_p9), 17   ;;  %s839_s13 = smov (!%p191_p9), 15  }
  0x10   : > { %s840_s23 = smov (!%p191_p9), 16   ;;  %s718_s9 = sshll.u32 (!%p191_p9), %s892_s22, 4 }
  0x13   : > { %v702_v0 = vld [vmem:[%s1059_s1 + $0xc] sm:$0xf]  ;;  %v708_v1 = vld [vmem:[%s1059_s1 + $0x14] sm:$0xf]  ;;  %v833_v2 = vmov 0   ;;  %s219_s15 = scalar_select %p218_p10, %s892_s22, 1 }
  0x14   : > { %766 = vset.pattern.permute.xlu0 %v833_v2  ;;  %767 = vset.pattern.permute.xlu1 %v833_v2  ;;  %v261_v3 = vld [vmem:[%s1059_s1] sm:$0xf]  ;;  %v703_v4 = vld [vmem:[%s1059_s1 + $0x18] sm:$0xf]  ;;  %v834_v7 = vmov 0.0   ;;  %vm294_vm0 = vcmask 1043456  }
  0x15   : > { %277 = vperm.xlu0 %766, %v702_v0   ;;  %409 = vperm.xlu1 %767, %v708_v1   ;;  %v709_v5 = vld [vmem:[%s1059_s1 + $0x20] sm:$0xf]  ;;  %s717_s16 = sshll.u32 %s219_s15, 3  ;;  %224 = vst [vmem:[#allocation2] sm:$0xf] %v834_v7  ;;  %vm296_vm1 = vcmask 916480  }
  0x16   : > { %768 = vset.pattern.permute.xlu2 %v833_v2  ;;  %s222_s25 = scalar_lea.vmem %s1058_s0, %s717_s16  ;;  %225 = vst [vmem:[#allocation2 + $0xc] sm:$0xf] %v834_v7  ;;  %v835_v8 = vmov 839922192   ;;  %v707_v21 = vld [vmem:[%s1059_s1 + $0x8] sm:$0xf] }
  0x17   : > { %264 = vperm.xlu2 %768, %v261_v3   ;;  %v939_v6 = vld [vmem:[%s222_s25] sm:$0xff]  ;;  %v267_v9 = vunpack.c.l.s4 %v835_v8  ;;  %v706_v30 = vld [vmem:[%s1059_s1 + $0x1c] sm:$0xf]  ;;  %v705_v32 = vld [vmem:[%s1059_s1 + $0x10] sm:$0xf]  ;;  %vm324_vm2 = vcmask 785408  }
  0x18   : > { %227 = vst [vmem:[#allocation2 + $0x4] sm:$0xff] %v939_v6  ;;  %vm475_vm3 = vcmask 138240   ;;  %vm512_vm6 = vcmask 121856   ;;  %vm575_vm9 = vcmask 130048   ;;  %vm582_vm10 = vcmask 1041408  }
  0x19   : > { %v942_v10 = vunpack.c.0.s8 %v267_v9  ;;  %vm578_vm11 = vcmask 31744  }
  0x1d   : > { %308 = vperm.xlu0 %766, %v703_v4   ;;  %435 = vperm.xlu1 %767, %v709_v5   ;;  %v953_v18 = vld [vmem:[#allocation2 + $0xc] sm:$0xf] }
  0x1f   : > { %v944_v12 = vld [vmem:[#allocation2] sm:$0xff]  ;;  %v946_v13 = vld [vmem:[#allocation2 + $0x8] sm:$0xf] }
  0x71   : > { %v265_v33 = vpop.permute.xlu2 %264 }
  0x72   : > { %v269_v37 = vperm.slane %v265_v33, %v942_v10 }
  0x74   : > { %v271_v40 = vmul.f32 %v269_v37, %v944_v12  ;;  %v272_v41 = vmul.f32 %v269_v37, %v946_v13 }
  0x87   : > { %v278_v11 = vpop.permute.xlu0 %277  ;;  %v410_v15 = vpop.permute.xlu1 %409 }
  0x88   : > { %v282_v14 = vperm.slane %v278_v11, %v942_v10  ;;  %v414_v25 = vperm.slane %v410_v15, %v942_v10 }
  0x8a   : > { %v284_v16 = vmul.f32 %v282_v14, %v944_v12  ;;  %v285_v17 = vmul.f32 %v282_v14, %v946_v13  ;;  %v416_v27 = vmul.f32 %v414_v25, %v939_v6  ;;  %v417_v29 = vmul.f32 %v414_v25, %v953_v18  ;;  %v531_v25 = vld [vmem:[%s1060_s2] sm:$0xf] }
  0x8c   : > { %290 = vrot.lane.b32.xlu0 %v285_v17, %s836_s26  ;;  %288 = vrot.lane.b32.xlu2 %v284_v16, %s836_s26 }
  0x8f   : > { %v309_v19 = vpop.permute.xlu0 %308  ;;  %v436_v24 = vpop.permute.xlu1 %435 }
  0x90   : > { %v313_v20 = vperm.slane %v309_v19, %v942_v10  ;;  %v440_v26 = vperm.slane %v436_v24, %v942_v10 }
  0x92   : > { %v315_v22 = vmul.f32 %v313_v20, %v939_v6  ;;  %v316_v23 = vmul.f32 %v313_v20, %v953_v18  ;;  %v442_v28 = vmul.f32 %v440_v26, %v939_v6  ;;  %v443_v31 = vmul.f32 %v440_v26, %v953_v18  ;;  %v704_v20 = vld [vmem:[%s1059_s1 + $0x4] sm:$0xf] }
  0x93   : > { %v228_v26 = vlaneseq }
  0x94   : > { %319 = vrot.lane.b32.xlu1 %v315_v22, %s837_s7  ;;  %396 = vperm.xlu0 %766, %v707_v21  }
  0x95   : > { %321 = vrot.lane.b32.xlu2 %v316_v23, %s837_s7 }
  0x9c   : > { %420 = vrot.lane.b32.xlu1 %v416_v27, %s836_s26  ;;  %446 = vrot.lane.b32.xlu0 %v442_v28, %s837_s7  ;;  %v229_v27 = vand.u32 127, %v228_v26 }
  0x9d   : > { %422 = vrot.lane.b32.xlu2 %v417_v29, %s836_s26 }
  0x9e   : > { %v230_v28 = vadd.s32 128, %v229_v27 }
  0xa0   : > { %v242_v29 = vand.u32 15, %v230_v28 }
  0xa2   : > { %vm256_vm4 = vcmp.ge.s32.totalorder %v242_v29, 1  ;;  %vm258_vm7 = vcmp.le.s32.totalorder %v242_v29, 14 }
  0xa4   : > { %448 = vrot.lane.b32.xlu1 %v443_v31, %s837_s7  ;;  %370 = vperm.xlu0 %766, %v706_v30   ;;  %v235_v30 = vand.u32 15, %v229_v27 }
  0xa5   : > { %349 = vperm.xlu2 %768, %v705_v32  }
  0xa6   : > { %vm255_vm5 = vcmp.ge.s32.totalorder %v235_v30, 1  ;;  %vm257_vm8 = vcmp.le.s32.totalorder %v235_v30, 14 }
  0xe6   : > { %v289_v34 = vpop.permute.xlu2 %288 }
  0xe7   : > { %v292_v38 = vrot.slane %v289_v34, 4 }
  0xef   : > { %v322_v46 = vpop.permute.xlu2 %321 }
  0xf7   : > { %v423_v60 = vpop.permute.xlu2 %422 }
  0xfe   : > { %v291_v35 = vpop.permute.xlu0 %290 }
  0xff   : > { %v293_v36 = vrot.slane %v291_v35, 4  ;;  %v301_v47 = vadd.f32 %v291_v35, %v272_v41  ;;  %v350_v17 = vpop.permute.xlu2 %349 }
 0x100   : > { %v354_v21 = vperm.slane %v350_v17, %v942_v10 }
 0x101   : > { %v295_v39 = vsel %vm294_vm0, %v292_v38, %v293_v36 }
 0x102   : > { %v297_v42 = vsel %vm296_vm1, %v289_v34, %v295_v39  ;;  %v356_v23 = vmul.f32 %v354_v21, %v939_v6 }
 0x103   : > { %v300_v48 = vadd.f32 %v297_v42, %v271_v40 }
 0x106   : > { %v320_v43 = vpop.permute.xlu1 %319  ;;  %v397_v44 = vpop.permute.xlu0 %396 }
 0x107   : > { %v323_v45 = vrot.slane %v320_v43, 4  ;;  %v401_v53 = vperm.slane %v397_v44, %v942_v10 }
 0x109   : > { %v325_v49 = vsel %vm324_vm2, %v323_v45, %v320_v43  ;;  %v326_v50 = vsel %vm324_vm2, %v323_v45, %v322_v46  ;;  %v403_v58 = vmul.f32 %v401_v53, %v944_v12  ;;  %v404_v2 = vmul.f32 %v401_v53, %v946_v13 }
 0x10a   : > { %v329_v51 = vadd.f32 %v325_v49, %v300_v48  ;;  %v330_v52 = vadd.f32 %v326_v50, %v301_v47 }
 0x10c   : > { %463 = vst [vmem:[#allocation1] ss:$2 sm:$0xff] %v329_v51 }
 0x10d   : > { %465 = vst [vmem:[#allocation1 + $0x10] ss:$2 sm:$0xff] %v330_v52 }
 0x10e   : > { %v421_v54 = vpop.permute.xlu1 %420  ;;  %v447_v55 = vpop.permute.xlu0 %446 }
 0x10f   : > { %v424_v56 = vrot.slane %v421_v54, 4  ;;  %v450_v57 = vrot.slane %v447_v55, 4 }
 0x111   : > { %v425_v59 = vsel %vm296_vm1, %v424_v56, %v421_v54  ;;  %v451_v62 = vsel %vm324_vm2, %v450_v57, %v447_v55  ;;  %v426_v1 = vsel %vm296_vm1, %v424_v56, %v423_v60 }
 0x112   : > { %v429_v61 = vadd.f32 %v425_v59, %v403_v58  ;;  %v430_v7 = vadd.f32 %v426_v1, %v404_v2 }
 0x113   : > { %v467_v63 = vld.sshfl [vmem:[#allocation1 + $0x8] sm:$0xff pattern:$0x75316420]  ;;  %v466_v0 = vld.sshfl [vmem:[#allocation1] sm:$0xff pattern:$0x75316420] }
 0x114   : > { %v455_v3 = vadd.f32 %v451_v62, %v429_v61  ;;  %v468_v4 = vld.sshfl [vmem:[#allocation1 + $0x10] sm:$0xff pattern:$0x75316420]  ;;  %471 = vrot.lane.b32.xlu1 %v467_v63, %s838_s12  ;;  %469 = vrot.lane.b32.xlu0 %v466_v0, %s838_s12 }
 0x115   : > { %473 = vrot.lane.b32.xlu2 %v468_v4, %s838_s12  ;;  %s631_s12 = scalar_lea.hbm %s1063_s5, %s718_s9 }
 0x116   : > { %500 = vst [vmem:[#allocation1] ss:$2 sm:$0xff] %v455_v3  ;;  %v449_v5 = vpop.permute.xlu1 %448  ;;  %v371_v11 = vpop.permute.xlu0 %370  ;;  %s635_s15 = sshll.u32 %s631_s12, 4  ;;  %s636_s15 = int_to_ptr.hbm [resolvable:$true] %s635_s15 }
 0x117   : > { %v452_v8 = vsel %vm324_vm2, %v450_v57, %v449_v5  ;;  %v375_v16 = vperm.slane %v371_v11, %v942_v10  ;;  %s783_s16 = sshra.s32 %s636_s15, 4  ;;  %s784_s16 = int_to_ptr.hbm [resolvable:$true] %s783_s16 }
 0x118   : > { %v456_v9 = vadd.f32 %v452_v8, %v430_v7  ;;  %s785_s17 = scalar_lea.hbm %s784_s16, 16  ;;  %p790_p0 = scmp.lt.s32.totalorder %s784_s16, %s1063_s5 }
 0x119   : > { %v377_v22 = vmul.f32 %v375_v16, %v939_v6  ;;  %v378_v24 = vmul.f32 %v375_v16, %v953_v18  ;;  %p786_p11 = scmp.ne.s32.totalorder %s784_s16, %s785_s17 }
 0x11a   : > { %502 = vst [vmem:[#allocation1 + $0x10] ss:$2 sm:$0xff] %v456_v9 }
 0x11b   : > { %p787_p12 = pnand %p786_p11, %p909_p5 }
 0x11d   : > { %v504_v14 = vld.sshfl [vmem:[#allocation1 + $0x8] sm:$0xff pattern:$0x75316420]  ;;  %v503_v15 = vld.sshfl [vmem:[#allocation1] sm:$0xff pattern:$0x75316420]  ;;  %p788_p13 = pneg %p787_p12 }
 0x11e   : > { %508 = vrot.lane.b32.xlu1 %v504_v14, %s839_s13  ;;  %506 = vrot.lane.b32.xlu0 %v503_v15, %s839_s13 }
 0x121   : > { %v505_v19 = vld.sshfl [vmem:[#allocation1 + $0x10] sm:$0xff pattern:$0x75316420] }
 0x122   : > { %510 = vrot.lane.b32.xlu2 %v505_v19, %s839_s13 }
 0x126   : > { %335 = vperm.xlu1 %767, %v704_v20   ;;  %381 = vrot.lane.b32.xlu0 %v377_v22, %s837_s7 }
 0x12a   : > { %358 = vrot.lane.b32.xlu2 %v356_v23, %s836_s26 }
 0x12e   : > { %383 = vrot.lane.b32.xlu1 %v378_v24, %s837_s7  ;;  %s215_s7 = sand.u32 1, %s823_s19  }
 0x12f   : > { %s699_s8 = sshll.u32 %s215_s7, 4  ;;  %s620_s22 = scalar_lea.sflag [#allocation4], %s215_s7 }
 0x130   : > { %s217_s13 = scalar_lea.vmem [#allocation3], %s699_s8 }
 0x131   : > { %s633_s14 = sshll.u32 %s217_s13, 4  ;;  %s634_s14 = int_to_ptr.vmem [resolvable:$true] %s633_s14 }
 0x136   : > { %534 = vperm.xlu1 %767, %v531_v25  }
 0x16f   : > { %v474_v31 = vpop.permute.xlu2 %473 }
 0x17c   : > { %v511_v38 = vpop.permute.xlu2 %510 }
 0x184   : > { %v359_v48 = vpop.permute.xlu2 %358 }
 0x185   : > { %v360_v51 = vrot.slane %v359_v48, 4 }
 0x186   : > { %v472_v6 = vpop.permute.xlu1 %471  ;;  %v470_v32 = vpop.permute.xlu0 %469 }
 0x187   : > { %v477_v33 = vsel %vm475_vm3, %v472_v6, %v474_v31  ;;  %v476_v18 = vsel %vm475_vm3, %v470_v32, %v472_v6  ;;  %v361_v57 = vsel %vm296_vm1, %v360_v51, %v359_v48  ;;  %v545_v31 = vld [vmem:[%s1061_s3] sm:$0xf] }
 0x188   : > { %v481_v34 = vsel %vm256_vm4, %v477_v33, 0.0  ;;  %v480_v36 = vsel %vm255_vm5, %v476_v18, 0.0 }
 0x189   : > { %v484_v35 = vrot.slane %v481_v34, 4 }
 0x18b   : > { %v485_v37 = vsel %vm294_vm0, %v480_v36, %v484_v35 }
 0x18c   : > { %486 = vrot.lane.b32.xlu2 %v485_v37, %s836_s26 }
 0x190   : > { %v509_v39 = vpop.permute.xlu1 %508  ;;  %v507_v40 = vpop.permute.xlu0 %506 }
 0x191   : > { %v514_v41 = vsel %vm512_vm6, %v509_v39, %v511_v38  ;;  %v513_v42 = vsel %vm512_vm6, %v507_v40, %v509_v39 }
 0x192   : > { %v518_v43 = vsel %vm258_vm7, %v514_v41, 0.0  ;;  %v517_v45 = vsel %vm257_vm8, %v513_v42, 0.0 }
 0x193   : > { %v521_v44 = vrot.slane %v518_v43, 4 }
 0x195   : > { %v522_v46 = vsel %vm294_vm0, %v517_v45, %v521_v44 }
 0x196   : > { %523 = vrot.lane.b32.xlu0 %v522_v46, %s836_s26  ;;  %s789_s26 = scalar_lea.hbm %s1063_s5, 32 }
 0x197   : > { %p791_p1 = scmp.lt.s32.totalorder %s789_s26, %s785_s17 }
 0x198   : > { %v336_v47 = vpop.permute.xlu1 %335  ;;  %v382_v52 = vpop.permute.xlu0 %381 }
 0x199   : > { %v340_v49 = vperm.slane %v336_v47, %v942_v10  ;;  %v385_v56 = vrot.slane %v382_v52, 4  ;;  %p792_p2 = por %p791_p1, %p790_p0 }
 0x19b   : > { %v342_v53 = vmul.f32 %v340_v49, %v944_v12  ;;  %v343_v55 = vmul.f32 %v340_v49, %v946_v13  ;;  %v386_v62 = vsel %vm324_vm2, %v385_v56, %v382_v52  ;;  %p793_p3 = pnand %p792_p2, %p788_p13 }
 0x19d   : > { %v364_v59 = vadd.f32 %v361_v57, %v342_v53  ;;  %v365_v61 = vadd.f32 %v360_v51, %v343_v55 }
 0x19f   : > { %v390_v1 = vadd.f32 %v386_v62, %v364_v59 }
 0x1a0   : > { %v384_v50 = vpop.permute.xlu1 %383 }
 0x1a1   : > { %v387_v60 = vsel %vm324_vm2, %v385_v56, %v384_v50 }
 0x1a2   : > { %v391_v63 = vadd.f32 %v387_v60, %v365_v61 }
 0x1a8   : > { %v535_v2 = vpop.permute.xlu1 %534 }
 0x1a9   : > { %v539_v13 = vperm.slane %v535_v2, %v942_v10  ;;  %v560_v10 = vld [vmem:[%s1062_s4] sm:$0xff] }
 0x1e6   : > { %v487_v54 = vpop.permute.xlu2 %486 }
 0x1e7   : > { %v488_v58 = vrot.slane %v487_v54, 4 }
 0x1e9   : > { %v489_v0 = vsel %vm296_vm1, %v488_v58, %v487_v54  ;;  %v493_v12 = vadd.f32 %v488_v58, %v391_v63 }
 0x1ea   : > { %v492_v5 = vadd.f32 %v489_v0, %v390_v1 }
 0x208   : > { %v524_v3 = vpop.permute.xlu0 %523 }
 0x209   : > { %v525_v4 = vrot.slane %v524_v3, 4 }
 0x20b   : > { %v526_v7 = vsel %vm296_vm1, %v525_v4, %v524_v3  ;;  %v530_v8 = vadd.f32 %v525_v4, %v493_v12 }
 0x20c   : > { %v529_v9 = vadd.f32 %v526_v7, %v492_v5 }
 0x20d   : > { %v542_v11 = vadd.f32 %v539_v13, %v530_v8 }
 0x20e   : > { %v541_v14 = vadd.f32 %v539_v13, %v529_v9 }
 0x20f   : > { %v544_v15 = vmax.f32 %v542_v11, 0.0 }
 0x210   : > { %v543_v16 = vmax.f32 %v541_v14, 0.0 }
 0x211   : > { %550 = vst [vmem:[#allocation1 + $0x10] ss:$2 sm:$0xff] %v544_v15 }
 0x212   : > { %548 = vst [vmem:[#allocation1] ss:$2 sm:$0xff] %v543_v16 }
 0x218   : > { %v553_v17 = vld.sshfl [vmem:[#allocation1 + $0x10] sm:$0xff pattern:$0x75316420] }
 0x219   : > { %v559_v19 = vpack.c.bf16 %v553_v17, %v553_v17  ;;  %v552_v20 = vld.sshfl [vmem:[#allocation1 + $0x8] sm:$0xff pattern:$0x75316420]  ;;  %v551_v21 = vld.sshfl [vmem:[#allocation1] sm:$0xff pattern:$0x75316420] }
 0x21a   : > { %v558_v22 = vpack.c.bf16 %v552_v20, %v552_v20  ;;  %v557_v23 = vpack.c.bf16 %v551_v21, %v551_v21 }
 0x21b   : > { %573 = vrot.lane.b32.xlu1 %v559_v19, %s840_s23 }
 0x21c   : > { %571 = vrot.lane.b32.xlu0 %v558_v22, %s840_s23  ;;  %569 = vrot.lane.b32.xlu2 %v557_v23, %s840_s23 }
 0x224   : > { %563 = vperm.xlu2 %768, %v560_v10  }
 0x276   : > { %v570_v25 = vpop.permute.xlu2 %569 }
 0x27e   : > { %v564_v6 = vpop.permute.xlu2 %563 }
 0x28d   : > { %v574_v24 = vpop.permute.xlu1 %573 }
 0x28e   : > { %v572_v26 = vpop.permute.xlu0 %571 }
 0x28f   : > { %v576_v27 = vsel %vm575_vm9, %v570_v25, %v572_v26  ;;  %v577_v28 = vsel %vm575_vm9, %v572_v26, %v574_v24 }
 0x290   : > { %v584_v29 = vsel %vm582_vm10, %v576_v27, 0  ;;  %v587_v30 = vsel %vm582_vm10, %v577_v28, 0 }
 0x291   : > { %596 = vmatpush.bf16.msra.mxu0 %v584_v29  ;;  %609 = vmatpush.bf16.msra.mxu1 %v587_v30 }
 0x294   : > { %710 = vmatmul.msk.bf16.vlgmr.msra.gmra.mxu0 %vm578_vm11, %v545_v31  ;;  %711 = vmatmul.msk.bf16.vlgmr.msra.gmra.mxu1 %vm578_vm11, %v545_v31 }
 0x311   : > { %v598_v32 = vpop.f32.mrf.mxu0  ;;  %v611_v33 = vpop.f32.mrf.mxu1 }
 0x312   : > { %v599_v18 = vadd.f32 %v598_v32, %v564_v6  ;;  %v612_v34 = vadd.f32 %v611_v33, %v564_v6 }
 0x314   : > { %v615_v35 = vmax.f32 %v599_v18, 0.0  ;;  %v616_v36 = vmax.f32 %v612_v34, 0.0 }
 0x316   : > { %617 = vst [vmem:[%s217_s13] sm:$0xff] %v615_v35 }
 0x317   : > { %618 = vst [vmem:[%s217_s13 + $0x8] sm:$0xff] %v616_v36 }
 0x318   : > { %796 = shalt.err (!%p793_p3)
}
 0x319   : > { %719 = dma.vmem_to_hbm [thread:$0]  (%p909_p5), %s634_s14, 256, %s636_s15, %s620_s22   ;;  %v600_v37 = vpop.f32.mrf.mxu0  ;;  %v613_v38 = vpop.f32.mrf.mxu1 }
 0x31a PF: > { %p725_p4 = scmp.ge.s32.totalorder %s831_s21, 2  ;;  %s647_s7 = sand.u32 1, %s819_s18  }
 0x31b   : > { %s648_s8 = scalar_lea.sflag [#allocation4], %s647_s7 }
 0x31c   : > { %p722_p7 = pnand %p725_p4, %p913_p6 }
 0x31e   : > { %p723_p8 = pneg %p722_p7 }
 0x320   : > { %814 = dma.done.wait (%p723_p8), %s648_s8, 256  }
 0x321   : > { %816 = vsyncadd (%p723_p8), %s648_s8, 4294967040  ;;  %p15_p5 = scmp.ge.s32.totalorder %s896_s24, 4   ;;  %s1066_s18 = smov %s823_s19 }
 0x322   : > { %s1067_s19 = smov %s827_s20  ;;  %s1068_s20 = smov %s907_s27 }
 0x323   : > { %s1069_s21 = smov %s896_s24  ;;  %17 = sbr.rel (!%p15_p5) target bundleno = 3 (0x3), region = 86 }
 0x328   :  { %654 = vsyncpa [#allocation4], 1 }
 0x329   :  { %656 = vsyncpa [#allocation4 + $0x1], 1 }

</bundles_post_ra>
